<compile_context>
chip_gen: v7x
topology: tpu7x:2x2x1
jax: 0.10.0
libtpu: 0.0.40
codegen_flags: <defaults>
</compile_context>

<pallas_src>
import functools

import jax
import jax.numpy as jnp
from jax.experimental import pallas as pl
from jax.experimental.pallas import tpu as pltpu


def _round_up(x, m):
    return ((x + m - 1) // m) * m


def _ipw_kernel(e_ref, x2_ref, w_ref, b_ref, out_ref):
    # W2[j*F+f, o] = wq[f] * (x @ weight)[j, o], built as a single resident MXU matmul.
    # Recomputed per row tile: O(N*F*in*out) MACs/step, small vs. the E-tile matmul, and
    # stays correct when the row axis is sharded "parallel" across TensorCores.
    w2 = jnp.dot(x2_ref[...], w_ref[...], preferred_element_type=jnp.float32)
    w2 = w2.astype(e_ref.dtype)  # match E dtype so the MXU runs a single bf16/f32 pass

    # out_tile = E2_tile @ W2  ==  (A @ support) for this tile of rows.
    out = jnp.dot(e_ref[...], w2, preferred_element_type=jnp.float32)
    out_ref[...] = (out + b_ref[...]).astype(out_ref.dtype)  # bias add stays f32 (v5e-safe)


def _choose_tile_n(n_rows8, e_row_bytes):
    # Keep each (double-buffered) E tile <= ~8 MiB and cap at 256 rows so total VMEM use
    # stays well under v7x's 64 MiB; v5e/v6e (128 MiB) fit trivially.
    budget = 8 * 1024 * 1024
    t = budget // max(e_row_bytes, 1)
    t = max(8, min(256, (t // 8) * 8))
    return min(t, n_rows8)


@functools.partial(jax.jit, static_argnames=("use_bf16",))
def ipw_forward(x, weight, E, weight_q, bias=None, *, use_bf16=False):
    """Fused IPW forward: (E @ weight_q).view(N, N) @ (x @ weight) + bias."""
    N, in_features = x.shape
    out_features = weight.shape[1]
    F = weight_q.shape[0]
    if bias is None:
        bias = jnp.zeros((out_features,), jnp.float32)

    # ---- wrapper-side layout glue (cheap / zero-copy XLA ops) ----
    out_pad = _round_up(out_features, 128)            # lane-dense output & weight columns
    E2 = E.reshape(N, N * F)                          # same row-major bytes as (N*N, F)
    X2 = (x[:, None, :] * weight_q.reshape(1, F, 1)).reshape(N * F, in_features)
    w_p = jnp.pad(weight, ((0, 0), (0, out_pad - out_features)))
    b_p = jnp.pad(bias.reshape(1, out_features),
                  ((0, 0), (0, out_pad - out_features))).astype(jnp.float32)

    mxu_dtype = jnp.bfloat16 if use_bf16 else jnp.float32   # MXU operands only
    E2 = E2.astype(mxu_dtype)
    X2 = X2.astype(mxu_dtype)
    w_p = w_p.astype(mxu_dtype)

    # ---- row tiling ----
    itemsize = jnp.dtype(mxu_dtype).itemsize
    n_rows8 = _round_up(N, 8)
    tile_n = _choose_tile_n(n_rows8, N * F * itemsize)
    n_pad = _round_up(N, tile_n)
    if n_pad != N:
        E2 = jnp.pad(E2, ((0, n_pad - N), (0, 0)))
    grid = (n_pad // tile_n,)

    # VMEM budget: double-buffered E/out tiles + resident X2/weight/bias + W2 temp.
    e_tile_b = tile_n * N * F * itemsize
    out_tile_b = tile_n * out_pad * 4
    resident_b = ((N * F * in_features + in_features * out_pad) * itemsize
                  + out_pad * 4 + N * F * out_pad * 4)
    vmem_limit = int(min(max(2 * (e_tile_b + out_tile_b) + 2 * resident_b + (2 << 20),
                             16 << 20), 60 << 20))

    flops = (2 * n_pad * (N * F) * out_pad
             + 2 * grid[0] * (N * F) * in_features * out_pad)
    bytes_accessed = ((n_pad * N * F + N * F * in_features + in_features * out_pad) * itemsize
                      + out_pad * 4 + n_pad * out_pad * 4)

    out = pl.pallas_call(
        _ipw_kernel,
        out_shape=jax.ShapeDtypeStruct((n_pad, out_pad), jnp.float32),
        grid=grid,
        in_specs=[
            pl.BlockSpec((tile_n, N * F), lambda i: (i, 0)),          # E2: streamed row tiles
            pl.BlockSpec((N * F, in_features), lambda i: (0, 0)),     # X2: resident
            pl.BlockSpec((in_features, out_pad), lambda i: (0, 0)),   # weight: resident
            pl.BlockSpec((1, out_pad), lambda i: (0, 0)),             # bias: resident
        ],
        out_specs=pl.BlockSpec((tile_n, out_pad), lambda i: (i, 0)),
        compiler_params=pltpu.CompilerParams(
            dimension_semantics=("parallel",),   # v7x: shard row tiles over the 2 TCs
            vmem_limit_bytes=vmem_limit,
        ),
        cost_estimate=pl.CostEstimate(flops=flops, transcendentals=0,
                                      bytes_accessed=bytes_accessed),
    )(E2, X2, w_p, b_p)

    return out[:N, :out_features]


def _uniform(key, shape, stdv):
    return jax.random.uniform(key, shape, dtype=jnp.float32, minval=-stdv, maxval=stdv)


def _reference(x, weight, E, weight_q, bias):
    support = x @ weight
    A = (E @ weight_q).reshape(x.shape[0], x.shape[0])
    return A @ support + bias


if __name__ == "__main__":
    key = jax.random.PRNGKey(0)

    # Case 1: f32, module-sized demo shapes (tight check).
    N, in_f, out_f, F = 8, 32, 32, 4
    k_x, k_e, k_w, k_b, k_q, key = jax.random.split(key, 6)
    stdv = 1.0 / (out_f ** 0.5)                 # mirrors reset_parameters()
    weight = _uniform(k_w, (in_f, out_f), stdv)
    bias = _uniform(k_b, (out_f,), stdv)
    weight_q = _uniform(k_q, (F, 1), 1.0)       # 1/sqrt(weight_q.size(1)) = 1
    x = jax.random.normal(k_x, (N, in_f), dtype=jnp.float32)
    E = jax.random.normal(k_e, (N * N, F), dtype=jnp.float32)
    # TODO(synk): torch.spmm uses a sparse E; dense stand-in here has identical math.

    out = jax.block_until_ready(ipw_forward(x, weight, E, weight_q, bias))
    ref = _reference(x, weight, E, weight_q, bias)
    assert out.shape == (N, out_f)
    assert jnp.allclose(out, ref, atol=1e-3, rtol=1e-3), "f32 mismatch vs reference"

    # Case 2: bf16 MXU operands (v6e/v7x bandwidth path); out=24 exercises the 128-lane
    # padding, N=40 exercises multi-row tiles and row handling.
    N, in_f, out_f, F = 40, 16, 24, 4
    k_x, k_e, k_w, k_b, k_q, key = jax.random.split(key, 6)
    stdv = 1.0 / (out_f ** 0.5)
    weight = _uniform(k_w, (in_f, out_f), stdv)
    bias = _uniform(k_b, (out_f,), stdv)
    weight_q = _uniform(k_q, (F, 1), 1.0)
    x = jax.random.normal(k_x, (N, in_f), dtype=jnp.float32)
    E = jax.random.normal(k_e, (N * N, F), dtype=jnp.float32)

    out_bf16 = jax.block_until_ready(
        ipw_forward(x, weight, E, weight_q, bias, use_bf16=True))
    ref2 = _reference(x, weight, E, weight_q, bias)
    assert out_bf16.shape == (N, out_f)
    assert jnp.allclose(out_bf16, ref2, atol=0.3, rtol=0.05), "bf16 mismatch vs reference"

    print("KERNEL_OK")
</pallas_src>

<mosaic_0001>
module attributes {stable_mosaic.version = 11 : i64} {
  func.func @_ipw_kernel(%arg0: i32, %arg1: memref<8x32xf32, #tpu.memory_space<vmem>>, %arg2: memref<32x32xf32, #tpu.memory_space<vmem>>, %arg3: memref<32x128xf32, #tpu.memory_space<vmem>>, %arg4: memref<1x128xf32, #tpu.memory_space<vmem>>, %arg5: memref<8x128xf32, #tpu.memory_space<vmem>>) attributes {dimension_semantics = [#tpu.dimension_semantics<parallel>], iteration_bounds = array<i64: 1>, scalar_prefetch = 0 : i64, scratch_operands = 0 : i64, tpu.core_type = #tpu.core_type<tc>, window_params = [{transform_indices = @transform_0, window_bounds = array<i64: 8, 32>}, {pipeline_mode = #tpu.pipeline_mode<synchronous>, transform_indices = @transform_1, window_bounds = array<i64: 32, 32>}, {pipeline_mode = #tpu.pipeline_mode<synchronous>, transform_indices = @transform_2, window_bounds = array<i64: 32, 128>}, {pipeline_mode = #tpu.pipeline_mode<synchronous>, transform_indices = @transform_3, window_bounds = array<i64: 1, 128>}, {transform_indices = @transform_4, window_bounds = array<i64: 8, 128>}]} {
    %c0 = arith.constant 0 : index
    %c0_0 = arith.constant 0 : index
    %0 = vector.load %arg2[%c0, %c0_0] : memref<32x32xf32, #tpu.memory_space<vmem>>, vector<32x32xf32>
    %c0_1 = arith.constant 0 : index
    %c0_2 = arith.constant 0 : index
    %1 = vector.load %arg3[%c0_1, %c0_2] : memref<32x128xf32, #tpu.memory_space<vmem>>, vector<32x128xf32>
    %cst = arith.constant dense<0.000000e+00> : vector<32x128xf32>
    %2 = tpu.matmul %0, %1, %cst {dimension_numbers = #tpu.dot_dimension_numbers<[1], [0], [0], [1], [0, 0, 1, 1], [], []>} : vector<32x32xf32>, vector<32x128xf32>, vector<32x128xf32> -> vector<32x128xf32>
    %c0_3 = arith.constant 0 : index
    %c0_4 = arith.constant 0 : index
    %3 = vector.load %arg1[%c0_3, %c0_4] : memref<8x32xf32, #tpu.memory_space<vmem>>, vector<8x32xf32>
    %cst_5 = arith.constant dense<0.000000e+00> : vector<8x128xf32>
    %4 = tpu.matmul %3, %2, %cst_5 {dimension_numbers = #tpu.dot_dimension_numbers<[1], [0], [0], [1], [0, 0, 1, 1], [], []>} : vector<8x32xf32>, vector<32x128xf32>, vector<8x128xf32> -> vector<8x128xf32>
    %c0_6 = arith.constant 0 : index
    %c0_7 = arith.constant 0 : index
    %5 = vector.load %arg4[%c0_6, %c0_7] : memref<1x128xf32, #tpu.memory_space<vmem>>, vector<1x128xf32>
    %6 = vector.broadcast %5 : vector<1x128xf32> to vector<8x128xf32>
    %7 = arith.addf %4, %6 : vector<8x128xf32>
    %c0_8 = arith.constant 0 : index
    %c0_9 = arith.constant 0 : index
    %8 = vector.load %arg5[%c0_8, %c0_9] : memref<8x128xf32, #tpu.memory_space<vmem>>, vector<8x128xf32>
    tpu.vector_store %arg5[%c0_8, %c0_9], %7 {strides = array<i32>} : memref<8x128xf32, #tpu.memory_space<vmem>>, vector<8x128xf32>,
    return
  }
  func.func @transform_0(%arg0: i32) -> (i32, i32) {
    %c0_i32 = arith.constant 0 : i32
    %c0_i32_0 = arith.constant 0 : i32
    return %arg0, %c0_i32 : i32, i32
  }
  func.func @transform_1(%arg0: i32) -> (i32, i32) {
    %c0_i32 = arith.constant 0 : i32
    %c0_i32_0 = arith.constant 0 : i32
    %c0_i32_1 = arith.constant 0 : i32
    return %c0_i32, %c0_i32_0 : i32, i32
  }
  func.func @transform_2(%arg0: i32) -> (i32, i32) {
    %c0_i32 = arith.constant 0 : i32
    %c0_i32_0 = arith.constant 0 : i32
    %c0_i32_1 = arith.constant 0 : i32
    return %c0_i32, %c0_i32_0 : i32, i32
  }
  func.func @transform_3(%arg0: i32) -> (i32, i32) {
    %c0_i32 = arith.constant 0 : i32
    %c0_i32_0 = arith.constant 0 : i32
    %c0_i32_1 = arith.constant 0 : i32
    return %c0_i32, %c0_i32_0 : i32, i32
  }
  func.func @transform_4(%arg0: i32) -> (i32, i32) {
    %c0_i32 = arith.constant 0 : i32
    %c0_i32_0 = arith.constant 0 : i32
    return %arg0, %c0_i32 : i32, i32
  }
}

</mosaic_0001>

<bundles_post_ra>
// kernel: ipw_forward.1
= control target key start
LH: loop header
LB: loop body
LE: loop exit
PB: predicated region body
PF: predicated region fallthrough
CT: control target
= control target key end

     0   :  { %vm26_vm0 = vcmask 261120   ;;  %s382_s0 = inlined_call_operand.vmem [shape: f32[8,32], index: 0, kind: input, shape index: {}]   ;;  %s383_s1 = inlined_call_operand.vmem [shape: f32[32,32], index: 1, kind: input, shape index: {}]   ;;  %s384_s2 = inlined_call_operand.vmem [shape: f32[32,128], index: 2, kind: input, shape index: {}]   ;;  %s385_s3 = inlined_call_operand.vmem [shape: f32[1,128], index: 3, kind: input, shape index: {}]   ;;  %s386_s4 = inlined_call_operand.hbm [shape: f32[8,128], index: 4, kind: output, shape index: {}]  }
   0x1   :  { %v22_v0 = vld [vmem:[%s384_s2] sm:$0xff]  ;;  %v23_v1 = vld [vmem:[%s384_s2 + $0x8] sm:$0xff]  ;;  %v24_v2 = vld [vmem:[%s384_s2 + $0x10] sm:$0xff] }
   0x2   :  { %v264_v3 = vpack.c.bf16 %v23_v1, %v22_v0  ;;  %v25_v4 = vld [vmem:[%s384_s2 + $0x18] sm:$0xff]  ;;  %v18_v5 = vld [vmem:[%s383_s1] sm:$0xff] }
   0x3   :  { %v268_v6 = vpack.c.bf16 %v25_v4, %v24_v2  ;;  %247 = vmatprep.mubr.msk.f32.mxu0 %vm26_vm0, %v18_v5 }
   0x4   :  { %9 = vsyncpa [#allocation3], 0  ;;  %265 = vmatprep.subr.bf16.mxu0 %v264_v3  ;;  %v19_v7 = vld [vmem:[%s383_s1 + $0x8] sm:$0xff]  ;;  %v20_v8 = vld [vmem:[%s383_s1 + $0x10] sm:$0xff]  ;;  %v306_v10 = vmov 0.0|0.0   ;;  %vm307_vm1 = vmmov 0  }
   0x5   :  { %267 = vmatpush3.bf16.msra.mxu0 %v264_v3  ;;  %v21_v9 = vld [vmem:[%s383_s1 + $0x18] sm:$0xff]  ;;  %272 = vmatprep.subr.bf16.mxu1 %v306_v10  ;;  %v308_v11 = vmov 0.0   ;;  %v124_v18 = vld [vmem:[%s382_s0] sm:$0xff]  ;;  %s309_s7 = smov [#allocation2]  }
   0x6   :  { %269 = vmatprep.subr.bf16.mxu0 %v268_v6  ;;  %261 = vmatprep.mubr.msk.f32.mxu1 %vm307_vm1, %v308_v11  ;;  %v224_v19 = vld [vmem:[%s385_s3] ss:$0 sm:$0xff]  ;;  %s212_s8 = sshll.u32 %s309_s7, 4  ;;  %s213_s8 = int_to_ptr.vmem [resolvable:$true] %s212_s8 }
   0x7   :  { %s282_s9 = scalar_lea.vmem %s213_s8, 128  ;;  %p287_p1 = scmp.lt.s32.totalorder %s213_s8, %s213_s8 }
   0x8   :  { %p283_p0 = scmp.ne.s32.totalorder %s213_s8, %s282_s9  ;;  %p288_p2 = scmp.lt.s32.totalorder %s282_s9, %s282_s9 }
   0x9   :  { %271 = vmatpush3.bf16.msra.mxu0 %v268_v6 }
   0xa   :  { %p289_p3 = por %p288_p2, %p287_p1 }
   0xc   :  { %248 = vmatmul.mubr.msk.f32.vlgmr.msra.gmra.mrb[0].mxu0 %vm26_vm0, %v19_v7  ;;  %p290_p4 = pnand %p289_p3, %p283_p0 }
   0xd   :  { %250 = vmatprep.mubr.msk.f32.mxu0 %vm26_vm0, %v20_v8 }
  0x10   :  { %251 = vmatmul.mubr.msk.f32.gmra.mrb[2].mxu0 %vm26_vm0, %v21_v9 }
  0xdf   :  { %v249_v12 = vpop.f32.mrb[0].mxu0 }
  0xe0   :  { %v105_v13 = vpop.f32.mrb[1].mxu0 }
  0xe1   :  { %v273_v14 = vpack.c.bf16 %v249_v12, %v105_v13 }
  0xe3   :  { %v252_v15 = vpop.f32.mrb[2].mxu0  ;;  %274 = vmatpush3.bf16.msra.mxu1 %v273_v14 }
  0xe4   :  { %v115_v16 = vpop.f32.mrb[3].mxu0  ;;  %275 = vmatprep.subr.bf16.mxu1 %v306_v10 }
  0xe5   :  { %v276_v17 = vpack.c.bf16 %v252_v15, %v115_v16 }
  0xe7   :  { %277 = vmatpush3.bf16.msra.mxu1 %v276_v17 }
  0xea   :  { %262 = vmatmul.mubr.msk.f32.vlgmr.msra.gmra.mrb[0].mxu1 %vm26_vm0, %v124_v18 }
 0x1bd   :  { %v201_v20 = vpop.f32.mrb[0].mxu1 }
 0x1be   :  { %v202_v21 = vadd.f32 %v224_v19, %v201_v20  ;;  %v263_v22 = vpop.f32.mrb[1].mxu1 }
 0x1c0   :  { %205 = vst [vmem:[#allocation2] sm:$0xff] %v202_v21 }
 0x1c1   :  { %293 = shalt.err (!%p290_p4)
}
 0x1c2   :  { %s294_s11 = scalar_lea.hbm %s386_s4, 128 }
 0x1c3   :  { %p295_p5 = scmp.ne.s32.totalorder %s386_s4, %s294_s11  ;;  %p298_p6 = scmp.lt.u32.totalorder %s294_s11, %s386_s4 }
 0x1c5   :  { %p300_p7 = pnand %p298_p6, %p295_p5 }
 0x1c7   :  { %303 = shalt.err (!%p300_p7)
}
 0x1c8   :  { %215 = dma.vmem_to_hbm [thread:$0]  %s213_s8, 128, %s386_s4, [#allocation3]  }
 0x1c9   :  { %304 = dma.done.wait [#allocation3], 128  }
 0x1ca   :  { %305 = vsyncadd [#allocation3], 4294967168 }
 0x1cb   :  { %219 = vsyncpa [#allocation3], 1 }

</bundles_post_ra>
